<compile_context>
chip_gen: v5e
topology: v5e:2x2
jax: 0.10.0
libtpu: 0.0.40
codegen_flags: <defaults>
</compile_context>

<pallas_src>
import jax
import jax.numpy as jnp
from jax.experimental import pallas as pl
from jax.experimental.pallas import tpu as pltpu


def _round_up(v, m):
    return (v + m - 1) // m * m


def _vmem_capacity_bytes():
    try:
        return int(pltpu.get_tpu_info().vmem_capacity_bytes)
    except Exception:
        return 64 * 1024 * 1024  # conservative per-TensorCore default (v7x)


def _patch_embed_kernel(p_ref, w_ref, b_ref, o_ref):
    # p_ref: (TILE_M, K_pad)  streamed patch tile (bf16 or f32)
    # w_ref: (K_pad,  E_pad)  mixed (entangled) weight, resident in VMEM
    # b_ref: (1, E_pad) f32   mixed bias (bias * mult), resident
    # o_ref: (TILE_M, E_pad)
    acc = jnp.dot(p_ref[...], w_ref[...], preferred_element_type=jnp.float32)
    o_ref[...] = (acc + b_ref[...]).astype(o_ref.dtype)


def weight_entangled_patchembed(x, weight, bias, alphas, embed_dims, patch_size,
                                *, compute_dtype=jnp.bfloat16, out_dtype=None,
                                tile_m_cap=512, vmem_budget_frac=0.6):
    """x: (B, C, H, W) NCHW; weight: (E, C, P, P); bias: (E,); alphas: (len(embed_dims),)."""
    B, C, H, W = x.shape
    E = weight.shape[0]
    P = patch_size
    assert H % P == 0 and W % P == 0
    nh, nw = H // P, W // P
    N = nh * nw
    K = C * P * P
    M = B * N
    out_dtype = compute_dtype if out_dtype is None else out_dtype

    # --- entanglement multiplier folded into weight and bias (wrapper, tiny) ---
    oidx = jnp.arange(E)
    mask = jnp.stack([(oidx < d) for d in embed_dims]).astype(jnp.float32)   # (n, E)
    mult = 1.0 + alphas.astype(jnp.float32) @ mask                           # (E,)
    w_flat = (weight.reshape(E, K).astype(jnp.float32) * mult[:, None]).T    # (K, E)
    bm = (bias.astype(jnp.float32) * mult).reshape(1, E)                     # mixed bias

    # --- lane-dense K / E ---
    K_pad = _round_up(K, 128)
    E_pad = _round_up(E, 128)
    # TODO(synk): rounding odd 128-multiples of K/E up to 256 fills the 256x256
    # MXU on v6e/v7x, but also inflates streamed/stored bytes; skipped.

    # --- patch extraction: one fused pass (cast -> transpose -> K pad) ---
    # TODO(synk): a fully fused version would gather patches inside the kernel
    # (NHWC input + per-(b, patch-row) BlockSpec gather); kept as wrapper glue,
    # written as a single XLA copy-fusion emitting bf16.
    patches = (
        x.astype(compute_dtype)
        .reshape(B, C, nh, P, nw, P)
        .transpose(0, 2, 4, 1, 3, 5)        # (B, nh, nw, C, P, P) -> conv flatten order
        .reshape(M, K)
    )
    if K_pad != K:
        patches = jnp.pad(patches, ((0, 0), (0, K_pad - K)))
    w_flat = w_flat.astype(compute_dtype)
    if (K_pad != K) or (E_pad != E):
        w_flat = jnp.pad(w_flat, ((0, K_pad - K), (0, E_pad - E)))
    if E_pad != E:
        bm = jnp.pad(bm, ((0, 0), (0, E_pad - E)))

    in_b = jnp.dtype(compute_dtype).itemsize
    out_b = jnp.dtype(out_dtype).itemsize

    # --- TILE_M from an explicit per-generation VMEM budget ---
    pack = 8 * (4 // in_b)                                   # sublane packing per dtype
    budget = int(vmem_budget_frac * _vmem_capacity_bytes())
    # TODO(synk): pipeline_mode=pl.Buffered(1) would single-buffer the resident
    # weight; instead we account for its default double buffer in the budget.
    resident = 2 * K_pad * E_pad * in_b + 2 * E_pad * 4      # weight + bias buffers
    per_row = 2 * (K_pad * in_b + E_pad * out_b)             # double-buffered in/out tiles
    tile_m = max(pack, max(budget - resident, per_row * pack) // per_row)
    tile_m = min(tile_m, tile_m_cap)
    if M > pack:                                             # >= 2 grid steps (v7x megacore)
        tile_m = min(tile_m, _round_up(pl.cdiv(M, 2), pack))
    tile_m = max(pack, (tile_m // pack) * pack)

    grid = (pl.cdiv(M, tile_m),)
    vmem_limit = int(min(_vmem_capacity_bytes(),
                         max(4 * (resident + per_row * tile_m), 32 * 1024 * 1024)))

    cost = pl.CostEstimate(
        flops=2 * M * K_pad * E_pad,
        transcendentals=0,
        bytes_accessed=M * K_pad * in_b + K_pad * E_pad * in_b
        + E_pad * 4 + M * E_pad * out_b,
    )

    out = pl.pallas_call(
        _patch_embed_kernel,
        out_shape=jax.ShapeDtypeStruct((M, E_pad), out_dtype),
        grid=grid,
        in_specs=[
            pl.BlockSpec((tile_m, K_pad), lambda i: (i, 0)),   # streamed patch tiles
            pl.BlockSpec((K_pad, E_pad), lambda i: (0, 0)),    # resident mixed weight
            pl.BlockSpec((1, E_pad), lambda i: (0, 0)),        # resident mixed bias
        ],
        out_specs=pl.BlockSpec((tile_m, E_pad), lambda i: (i, 0)),
        compiler_params=pltpu.CompilerParams(
            dimension_semantics=("parallel",),
            vmem_limit_bytes=vmem_limit,
        ),
        cost_estimate=cost,
    )(patches, w_flat, bm)

    return out[:, :E].reshape(B, N, E)


def _reference(x, weight, bias, alphas, embed_dims, patch_size):
    # pure-JAX reference mirroring the PyTorch module
    E = weight.shape[0]
    mixed_w = weight.astype(jnp.float32)
    mixed_b = bias.astype(jnp.float32)
    for d, a in zip(embed_dims, alphas):
        sub_w = jnp.pad(weight[:d], ((0, E - d), (0, 0), (0, 0), (0, 0)))
        sub_b = jnp.pad(bias[:d], (0, E - d))
        mixed_w = mixed_w + a * sub_w
        mixed_b = mixed_b + a * sub_b
    out = jax.lax.conv_general_dilated(
        x.astype(jnp.float32), mixed_w,
        window_strides=(patch_size, patch_size), padding="VALID",
        dimension_numbers=("NCHW", "OIHW", "NCHW"),
    )
    out = out + mixed_b[None, :, None, None]
    B, Eo, h, w = out.shape
    return out.reshape(B, Eo, h * w).transpose(0, 2, 1)


if __name__ == "__main__":
    key = jax.random.PRNGKey(0)
    k1, k2, k3, k4 = jax.random.split(key, 4)

    # small shapes consistent with the module
    B, C, H, W = 2, 4, 16, 16
    P = 4                      # patch_size
    E = 32                     # super embed_dim
    embed_dims = [8, 16, 24]   # candidate sub embed dims

    x = jax.random.normal(k1, (B, C, H, W), dtype=jnp.float32)
    weight = jax.random.normal(k2, (E, C, P, P), dtype=jnp.float32) * 0.1
    bias = jax.random.normal(k3, (E,), dtype=jnp.float32) * 0.1
    alphas = jax.nn.softmax(jax.random.normal(k4, (len(embed_dims),), dtype=jnp.float32))

    ref = _reference(x, weight, bias, alphas, embed_dims, P)

    # default bf16 MXU path (bf16 patches/weight, f32 accumulate, bf16 output)
    fwd_bf16 = jax.jit(lambda x_, w_, b_, a_: weight_entangled_patchembed(
        x_, w_, b_, a_, embed_dims, P))
    out_bf16 = jax.block_until_ready(fwd_bf16(x, weight, bias, alphas))
    assert out_bf16.shape == (B, (H // P) * (W // P), E)
    assert jnp.allclose(out_bf16.astype(jnp.float32), ref, atol=5e-2, rtol=5e-2)

    # full-precision path (f32 compute + f32 output)
    fwd_f32 = jax.jit(lambda x_, w_, b_, a_: weight_entangled_patchembed(
        x_, w_, b_, a_, embed_dims, P,
        compute_dtype=jnp.float32, out_dtype=jnp.float32))
    out_f32 = jax.block_until_ready(fwd_f32(x, weight, bias, alphas))
    assert out_f32.shape == (B, (H // P) * (W // P), E)
    assert jnp.allclose(out_f32, ref, atol=1e-4, rtol=1e-4)

    print("KERNEL_OK")
</pallas_src>

<mosaic_0001>
module attributes {stable_mosaic.version = 11 : i64} {
  func.func @_patch_embed_kernel(%arg0: i32, %arg1: memref<16x128xbf16, #tpu.memory_space<vmem>>, %arg2: memref<128x128xbf16, #tpu.memory_space<vmem>>, %arg3: memref<1x128xf32, #tpu.memory_space<vmem>>, %arg4: memref<16x128xbf16, #tpu.memory_space<vmem>>) attributes {dimension_semantics = [#tpu.dimension_semantics<parallel>], iteration_bounds = array<i64: 2>, scalar_prefetch = 0 : i64, scratch_operands = 0 : i64, tpu.core_type = #tpu.core_type<tc>, window_params = [{transform_indices = @transform_0, window_bounds = array<i64: 16, 128>}, {pipeline_mode = #tpu.pipeline_mode<synchronous>, transform_indices = @transform_1, window_bounds = array<i64: 128, 128>}, {pipeline_mode = #tpu.pipeline_mode<synchronous>, transform_indices = @transform_2, window_bounds = array<i64: 1, 128>}, {transform_indices = @transform_3, window_bounds = array<i64: 16, 128>}]} {
    %c0 = arith.constant 0 : index
    %c0_0 = arith.constant 0 : index
    %0 = vector.load %arg1[%c0, %c0_0] : memref<16x128xbf16, #tpu.memory_space<vmem>>, vector<16x128xbf16>
    %c0_1 = arith.constant 0 : index
    %c0_2 = arith.constant 0 : index
    %1 = vector.load %arg2[%c0_1, %c0_2] : memref<128x128xbf16, #tpu.memory_space<vmem>>, vector<128x128xbf16>
    %cst = arith.constant dense<0.000000e+00> : vector<16x128xf32>
    %2 = tpu.matmul %0, %1, %cst {dimension_numbers = #tpu.dot_dimension_numbers<[1], [0], [0], [1], [0, 0, 1, 1], [], []>} : vector<16x128xbf16>, vector<128x128xbf16>, vector<16x128xf32> -> vector<16x128xf32>
    %c0_3 = arith.constant 0 : index
    %c0_4 = arith.constant 0 : index
    %3 = vector.load %arg3[%c0_3, %c0_4] : memref<1x128xf32, #tpu.memory_space<vmem>>, vector<1x128xf32>
    %4 = vector.broadcast %3 : vector<1x128xf32> to vector<16x128xf32>
    %5 = arith.addf %2, %4 : vector<16x128xf32>
    %6 = arith.truncf %5 : vector<16x128xf32> to vector<16x128xbf16>
    %c0_5 = arith.constant 0 : index
    %c0_6 = arith.constant 0 : index
    %7 = vector.load %arg4[%c0_5, %c0_6] : memref<16x128xbf16, #tpu.memory_space<vmem>>, vector<16x128xbf16>
    tpu.vector_store %arg4[%c0_5, %c0_6], %6 {strides = array<i32>} : memref<16x128xbf16, #tpu.memory_space<vmem>>, vector<16x128xbf16>,
    return
  }
  func.func @transform_0(%arg0: i32) -> (i32, i32) {
    %c0_i32 = arith.constant 0 : i32
    %c0_i32_0 = arith.constant 0 : i32
    return %arg0, %c0_i32 : i32, i32
  }
  func.func @transform_1(%arg0: i32) -> (i32, i32) {
    %c0_i32 = arith.constant 0 : i32
    %c0_i32_0 = arith.constant 0 : i32
    %c0_i32_1 = arith.constant 0 : i32
    return %c0_i32, %c0_i32_0 : i32, i32
  }
  func.func @transform_2(%arg0: i32) -> (i32, i32) {
    %c0_i32 = arith.constant 0 : i32
    %c0_i32_0 = arith.constant 0 : i32
    %c0_i32_1 = arith.constant 0 : i32
    return %c0_i32, %c0_i32_0 : i32, i32
  }
  func.func @transform_3(%arg0: i32) -> (i32, i32) {
    %c0_i32 = arith.constant 0 : i32
    %c0_i32_0 = arith.constant 0 : i32
    return %arg0, %c0_i32 : i32, i32
  }
}

</mosaic_0001>

<bundles_post_ra>
// kernel: _lambda_.1
= control target key start
LH: loop header
LB: loop body
LE: loop exit
PB: predicated region body
PF: predicated region fallthrough
CT: control target
= control target key end

     0   :  { %8 = vsyncpa [#allocation3], 0  ;;  %s649_s0 = inlined_call_operand.vmem [shape: bf16[32,128], index: 0, kind: input, shape index: {}]   ;;  %s650_s1 = inlined_call_operand.vmem [shape: bf16[128,128], index: 1, kind: input, shape index: {}]   ;;  %s651_s2 = inlined_call_operand.vmem [shape: f32[1,128], index: 2, kind: input, shape index: {}]   ;;  %s652_s3 = inlined_call_operand.hbm [shape: bf16[32,128], index: 3, kind: output, shape index: {}]  }
   0x1   :  { %10 = vsyncpa [#allocation3 + $0x1], 0  ;;  %s535_s12 = smov 0   ;;  %s537_s13 = smov 0  }
   0x2   :  { %s539_s14 = smov 0   ;;  %s541_s15 = smov 0  }
   0x3 LB: > { %s556_s16 = sadd.s32 4294967295, %s511_s15   ;;  %s344_s17 = sadd.s32 4294967294, %s511_s15   ;;  %s511_s15 = sphi %s541_s15, %s658_s15   ;;  %s507_s14 = sphi %s539_s14, %s657_s14   ;;  %s503_s13 = sphi %s537_s13, %s656_s13   ;;  %s499_s12 = sphi %s535_s12, %s655_s12  }
   0x4   : > { %s560_s18 = sadd.s32 1, %s511_s15   ;;  %s91_s19 = sadd.s32 1, %s507_s14 }
   0x5   : > { %s88_s20 = ssub.s32 %s511_s15, %s560_s18  ;;  %p101_p0 = scmp.ne.s32.totalorder %s507_s14, %s503_s13 }
   0x6   : > { %p89_p1 = scmp.eq.s32.totalorder %s88_s20, 0  ;;  %p102_p2 = scmp.eq.s32.totalorder %s556_s16, 1 }
   0x7   : > { %p107_p3 = scmp.ne.s32.totalorder %s503_s13, %s499_s12  ;;  %p108_p4 = scmp.eq.s32.totalorder %s344_s17, 1 }
   0x8   : > { %s571_s21 = scalar_select %p89_p1, %s507_s14, %s91_s19  }
   0x9   : > { %p573_p5 = por %p102_p2, %p101_p0  ;;  %p577_p6 = por %p108_p4, %p107_p3 }
   0xa   : > { %p347_p7 = scmp.ge.s32.totalorder %s511_s15, 1  ;;  %p141_p8 = scmp.lt.s32.totalorder %s511_s15, 3 }
   0xc   : > { %p142_p9 = pnand %p347_p7, %p141_p8 }
   0xd   : > { %s349_s5 = sshll.u32 (!%p142_p9), %s556_s16, 1  ;;  %s162_s27 = sand.u32 (!%p142_p9), 1, %s503_s13  }
   0xe   : > { %145 = sbr.rel (%p142_p9) target bundleno = 193 (0xc1), region = 32  ;;  %p166_p10 = scmp.lt.s32.totalorder (!%p142_p9), %s349_s5, 3 }
   0xf   : > { %s348_s28 = sshll.u32 (!%p142_p9), %s162_s27, 3  ;;  %s401_s29 = sshll.u32 (!%p142_p9), %s556_s16, 3 }
  0x10   : > { %s164_s8 = scalar_lea.vmem (!%p142_p9), [#allocation2], %s348_s28  ;;  %s267_s16 = scalar_lea.sflag (!%p142_p9), [#allocation3], %s162_s27 }
  0x11   : > { %s619_s9 = sshll.u32 (!%p142_p9), %s164_s8, 4  ;;  %s469_s24 = scalar_lea.hbm (!%p142_p9), %s652_s3, 16  ;;  %s280_s9 = int_to_ptr.vmem [resolvable:$true] %s619_s9 }
  0x13   : > { %v400_v0 = vld [vmem:[%s650_s1 + $0x38] sm:$0xff]  ;;  %v399_v1 = vld [vmem:[%s650_s1 + $0x30] sm:$0xff]  ;;  %v398_v2 = vld [vmem:[%s650_s1 + $0x28] sm:$0xff]  ;;  %s660_s5 = smov (!%p166_p10, %s349_s5), 3 }
  0x14   : > { %248 = vmatpush.bf16.msra.mxu0 %v400_v0  ;;  %v397_v3 = vld [vmem:[%s650_s1 + $0x20] sm:$0xff]  ;;  %v396_v4 = vld [vmem:[%s650_s1 + $0x18] sm:$0xff]  ;;  %v395_v5 = vld [vmem:[%s650_s1 + $0x10] sm:$0xff]  ;;  %s350_s17 = sshll.u32 %s660_s5, 2  ;;  %s278_s5 = scalar_lea.hbm %s652_s3, %s401_s29 }
  0x15   : > { %v394_v6 = vld [vmem:[%s650_s1 + $0x8] sm:$0xff]  ;;  %v393_v7 = vld [vmem:[%s650_s1] sm:$0xff]  ;;  %s169_s26 = scalar_lea.vmem %s649_s0, %s350_s17  ;;  %s281_s10 = sshll.u32 %s278_s5, 4  ;;  %s282_s10 = int_to_ptr.hbm [resolvable:$true] %s281_s10 }
  0x16   : > { %v392_v8 = vld [vmem:[%s169_s26] sm:$0xff]  ;;  %s463_s11 = sshra.s32 %s282_s10, 4  ;;  %s464_s11 = int_to_ptr.hbm [resolvable:$true] %s463_s11 }
  0x17   : > { %v448_v10 = vld [vmem:[%s651_s2] ss:$0 sm:$0xff]  ;;  %s465_s17 = scalar_lea.hbm %s464_s11, 8  ;;  %p470_p0 = scmp.lt.s32.totalorder %s464_s11, %s652_s3 }
  0x18   : > { %249 = vmatpush.bf16.msra.mxu0 %v399_v1  ;;  %p466_p11 = scmp.ne.s32.totalorder %s464_s11, %s465_s17  ;;  %p471_p1 = scmp.lt.s32.totalorder %s469_s24, %s465_s17 }
  0x1a   : > { %p467_p12 = pnand %p466_p11, %p573_p5  ;;  %p472_p2 = por %p471_p1, %p470_p0 }
  0x1c   : > { %250 = vmatpush.bf16.msra.mxu0 %v398_v2  ;;  %p468_p13 = pneg %p467_p12 }
  0x1e   : > { %p473_p3 = pnand %p472_p2, %p468_p13 }
  0x20   : > { %251 = vmatpush.bf16.msra.mxu0 %v397_v3 }
  0x24   : > { %252 = vmatpush.bf16.msra.mxu0 %v396_v4 }
  0x28   : > { %253 = vmatpush.bf16.msra.mxu0 %v395_v5 }
  0x2c   : > { %254 = vmatpush.bf16.msra.mxu0 %v394_v6 }
  0x30   : > { %255 = vmatpush.bf16.msra.mxu0 %v393_v7 }
  0x33   : > { %256 = vmatmul.bf16.vlgmr.msra.gmra.mxu0 %v392_v8 }
  0xb0   : > { %v257_v9 = vpop.f32.mrf.mxu0 }
  0xb1   : > { %v258_v12 = vadd.f32 %v448_v10, %v257_v9 }
  0xb8   : > { %v259_v11 = vpop.f32.mrf.mxu0 }
  0xb9   : > { %v260_v13 = vadd.f32 %v448_v10, %v259_v11 }
  0xbb   : > { %v405_v14 = vpack.c.bf16 %v260_v13, %v258_v12 }
  0xbd   : > { %406 = vst [vmem:[%s164_s8] sm:$0xff] %v405_v14  }
  0xbe   : > { %476 = shalt.err (!%p473_p3)
}
  0xbf   : > { %s513_s27 = smov 64   ;;  %s514_s28 = smov 4  }
  0xc0   : > { %407 = dma.vmem_to_hbm [thread:$0]  (%p573_p5), %s280_s9, 128, %s282_s10, %s267_s16, %s513_s27, %s513_s27, %s514_s28  }
  0xc1 PF: > { %p413_p4 = scmp.ge.s32.totalorder %s511_s15, 2  ;;  %s296_s29 = sand.u32 1, %s499_s12  }
  0xc2   : > { %s297_s30 = scalar_lea.sflag [#allocation3], %s296_s29 }
  0xc3   : > { %p410_p7 = pnand %p413_p4, %p577_p6 }
  0xc5   : > { %p411_p8 = pneg %p410_p7 }
  0xc7   : > { %494 = dma.done.wait (%p411_p8), %s297_s30, 128  }
  0xc8   : > { %496 = vsyncadd (%p411_p8), %s297_s30, 4294967168  ;;  %p13_p9 = scmp.ge.s32.totalorder %s560_s18, 4   ;;  %s655_s12 = smov %s503_s13 }
  0xc9   : > { %s656_s13 = smov %s507_s14  ;;  %s657_s14 = smov %s571_s21 }
  0xca   : > { %s658_s15 = smov %s560_s18  ;;  %15 = sbr.rel (!%p13_p9) target bundleno = 3 (0x3), region = 67 }
  0xcf   :  { %303 = vsyncpa [#allocation3], 1 }
  0xd0   :  { %305 = vsyncpa [#allocation3 + $0x1], 1 }

</bundles_post_ra>
